<compile_context>
chip_gen: v5e
topology: v5e:2x2
jax: 0.10.0
libtpu: 0.0.40
codegen_flags: <defaults>
</compile_context>

<pallas_src>
import jax
import jax.numpy as jnp
from jax.experimental import pallas as pl
from jax.experimental.pallas import tpu as pltpu


_SQRT_2_OVER_PI = 0.7978845608028654


def _gelu_tanh(x):
    # TODO(synk): nn.GELU() default is the exact erf form; erf has no reliable
    # Mosaic lowering, so the tanh approximation (EUP tanh) is used here and in
    # the reference (difference is ~1e-3 level).
    return 0.5 * x * (1.0 + jnp.tanh(_SQRT_2_OVER_PI * (x + 0.044715 * x * x * x)))


def mlp_kernel(x_ref, w1_ref, b1_ref, w2_ref, b2_ref, out_ref):
    # x_ref: (Tm, E) f32   w1_ref: (E, M) bf16   b1_ref: (1, M) f32
    # w2_ref: (M, E) bf16  b2_ref: (1, E) f32    out_ref: (Tm, E)
    x = x_ref[...].astype(w1_ref.dtype)                  # in-kernel bf16 cast
    h = jnp.dot(x, w1_ref[...], preferred_element_type=jnp.float32)
    h = _gelu_tanh(h + b1_ref[...])                      # f32 bias + GELU
    # TODO(synk): dropout omitted (eval/inference semantics); training-mode
    # dropout would use pltpu.prng_seed + pltpu.prng_random_bits masking.
    h = h.astype(w2_ref.dtype)                           # bf16 for the MXU
    o = jnp.dot(h, w2_ref[...], preferred_element_type=jnp.float32)
    out_ref[...] = (o + b2_ref[...]).astype(out_ref.dtype)   # full-tile store


def _per_generation_defaults():
    """Returns (block_rows, vmem_limit_bytes) based on the TPU generation."""
    vmem_bytes = None
    try:
        vmem_bytes = pltpu.get_tpu_info().vmem_capacity_bytes
    except Exception:
        pass
    if vmem_bytes is not None and vmem_bytes >= 96 * 1024 * 1024:
        # v5e / v6e: 128 MiB VMEM per TensorCore -> bigger tiles, bigger budget.
        return 512, 100 * 1024 * 1024
    # v7x (64 MiB / TC) or unknown: conservative budget.
    return 256, 48 * 1024 * 1024


def _round_rows(tm):
    """Round the row tile to MXU-friendly granularity (never below 16)."""
    if tm >= 256:
        return (tm // 256) * 256
    if tm >= 128:
        return 128
    return max(16, (tm // 16) * 16)


def _resident_spec(shape, single_buffer):
    """Constant-index BlockSpec (VMEM-resident operand), single-buffered if possible."""
    index_map = lambda i: (0,) * len(shape)
    if single_buffer:
        try:
            return pl.BlockSpec(shape, index_map, pipeline_mode=pl.Buffered(1))
        except Exception:
            pass
    return pl.BlockSpec(shape, index_map)


def mlp_forward(x, w1_t, b1, w2_t, b2, *, block_rows=None,
                matmul_dtype=jnp.bfloat16, out_dtype=None):
    """x: (B, S, E); w1_t: (E, M) (= torch fc1.weight.T); b1: (M,);
       w2_t: (M, E) (= torch fc2.weight.T); b2: (E,)  ->  (B, S, E)."""
    B, S, E = x.shape
    M = w1_t.shape[1]
    out_dtype = x.dtype if out_dtype is None else out_dtype

    N = B * S
    xf = x.reshape(N, E)                       # no wrapper-side dtype cast

    default_rows, vmem_limit = _per_generation_defaults()
    if block_rows is None:
        block_rows = default_rows

    tm = _round_rows(min(block_rows, max(16, pl.cdiv(N, 16) * 16)))
    grid = (pl.cdiv(N, tm),)                   # ragged tail -> masked writes

    # Weights: use as-is if already in matmul dtype (pre-materialize bf16
    # weights outside the per-call path to avoid re-casting HBM traffic).
    w1c = w1_t if w1_t.dtype == matmul_dtype else w1_t.astype(matmul_dtype)
    w2c = w2_t if w2_t.dtype == matmul_dtype else w2_t.astype(matmul_dtype)
    b1r = b1.reshape(1, M).astype(jnp.float32)
    b2r = b2.reshape(1, E).astype(jnp.float32)

    def call(single_buffer_resident):
        return pl.pallas_call(
            mlp_kernel,
            out_shape=jax.ShapeDtypeStruct((N, E), out_dtype),
            grid_spec=pltpu.PrefetchScalarGridSpec(
                num_scalar_prefetch=0,
                grid=grid,
                in_specs=[
                    pl.BlockSpec((tm, E), lambda i: (i, 0)),      # streamed x
                    _resident_spec((E, M), single_buffer_resident),  # w1
                    _resident_spec((1, M), single_buffer_resident),  # b1
                    _resident_spec((M, E), single_buffer_resident),  # w2
                    _resident_spec((1, E), single_buffer_resident),  # b2
                ],
                out_specs=pl.BlockSpec((tm, E), lambda i: (i, 0)),
            ),
            compiler_params=pltpu.CompilerParams(
                dimension_semantics=("parallel",),   # megacore split on v7x
                vmem_limit_bytes=vmem_limit,
            ),
        )(xf, w1c, b1r, w2c, b2r)

    try:
        out = call(True)
    except Exception:
        out = call(False)        # JAX without pipeline_mode support
    return out.reshape(B, S, E)


if __name__ == "__main__":
    # Small shapes consistent with the module: B=2, seq=12, emb_dim=32, mlp_dim=64.
    # N = 24 tokens: with block_rows=16 this gives a 2-step grid whose last
    # block is ragged, exercising the masked-write (no-pad) path.
    B, S, E, M = 2, 12, 32, 64

    key = jax.random.PRNGKey(0)
    k_x, k_w1, k_b1, k_w2, k_b2 = jax.random.split(key, 5)

    x = jax.random.normal(k_x, (B, S, E), dtype=jnp.float32)
    # torch layouts: fc1.weight (M,E), fc1.bias (M,), fc2.weight (E,M), fc2.bias (E,)
    w1 = jax.random.normal(k_w1, (M, E), dtype=jnp.float32) * 0.05
    b1 = jax.random.normal(k_b1, (M,), dtype=jnp.float32) * 0.05
    w2 = jax.random.normal(k_w2, (E, M), dtype=jnp.float32) * 0.05
    b2 = jax.random.normal(k_b2, (E,), dtype=jnp.float32) * 0.05

    # Pre-materialize bf16 weights once (outside the per-call path).
    w1_t = w1.T.astype(jnp.bfloat16)      # (E, M)
    w2_t = w2.T.astype(jnp.bfloat16)      # (M, E)

    # Explicit small tile -> multi-step grid with ragged masked tail.
    out_small = jax.block_until_ready(
        mlp_forward(x, w1_t, b1, w2_t, b2, block_rows=16))
    # Per-generation default tile / VMEM budget path.
    out_default = jax.block_until_ready(mlp_forward(x, w1_t, b1, w2_t, b2))

    # Pure-JAX reference with the same bf16-operand / f32-accumulate recipe.
    xr = x.reshape(-1, E).astype(jnp.bfloat16)
    h_ref = jnp.dot(xr, w1_t, preferred_element_type=jnp.float32) + b1
    h_ref = _gelu_tanh(h_ref)
    o_ref = jnp.dot(h_ref.astype(jnp.bfloat16), w2_t,
                    preferred_element_type=jnp.float32) + b2
    ref = o_ref.astype(x.dtype).reshape(B, S, E)

    assert out_small.shape == (B, S, E)
    assert out_default.shape == (B, S, E)
    assert jnp.allclose(out_small, ref, atol=1e-2, rtol=1e-2)
    assert jnp.allclose(out_default, ref, atol=1e-2, rtol=1e-2)

    print("KERNEL_OK")
</pallas_src>

<mosaic_0001>
module attributes {stable_mosaic.version = 11 : i64} {
  func.func @mlp_kernel(%arg0: i32, %arg1: memref<16x32xf32, #tpu.memory_space<vmem>>, %arg2: memref<32x64xbf16, #tpu.memory_space<vmem>>, %arg3: memref<1x64xf32, #tpu.memory_space<vmem>>, %arg4: memref<64x32xbf16, #tpu.memory_space<vmem>>, %arg5: memref<1x32xf32, #tpu.memory_space<vmem>>, %arg6: memref<16x32xf32, #tpu.memory_space<vmem>>) attributes {dimension_semantics = [#tpu.dimension_semantics<parallel>], iteration_bounds = array<i64: 2>, scalar_prefetch = 0 : i64, scratch_operands = 0 : i64, tpu.core_type = #tpu.core_type<tc>, window_params = [{transform_indices = @transform_0, window_bounds = array<i64: 16, 32>}, {pipeline_mode = #tpu.pipeline_mode<synchronous>, transform_indices = @transform_1, window_bounds = array<i64: 32, 64>}, {pipeline_mode = #tpu.pipeline_mode<synchronous>, transform_indices = @transform_2, window_bounds = array<i64: 1, 64>}, {pipeline_mode = #tpu.pipeline_mode<synchronous>, transform_indices = @transform_3, window_bounds = array<i64: 64, 32>}, {pipeline_mode = #tpu.pipeline_mode<synchronous>, transform_indices = @transform_4, window_bounds = array<i64: 1, 32>}, {transform_indices = @transform_5, window_bounds = array<i64: 16, 32>}]} {
    %c0 = arith.constant 0 : index
    %c0_0 = arith.constant 0 : index
    %0 = vector.load %arg1[%c0, %c0_0] : memref<16x32xf32, #tpu.memory_space<vmem>>, vector<16x32xf32>
    %1 = arith.truncf %0 : vector<16x32xf32> to vector<16x32xbf16>
    %c0_1 = arith.constant 0 : index
    %c0_2 = arith.constant 0 : index
    %2 = vector.load %arg2[%c0_1, %c0_2] : memref<32x64xbf16, #tpu.memory_space<vmem>>, vector<32x64xbf16>
    %cst = arith.constant dense<0.000000e+00> : vector<16x64xf32>
    %3 = tpu.matmul %1, %2, %cst {dimension_numbers = #tpu.dot_dimension_numbers<[1], [0], [0], [1], [0, 0, 1, 1], [], []>} : vector<16x32xbf16>, vector<32x64xbf16>, vector<16x64xf32> -> vector<16x64xf32>
    %c0_3 = arith.constant 0 : index
    %c0_4 = arith.constant 0 : index
    %4 = vector.load %arg3[%c0_3, %c0_4] : memref<1x64xf32, #tpu.memory_space<vmem>>, vector<1x64xf32>
    %5 = vector.broadcast %4 : vector<1x64xf32> to vector<16x64xf32>
    %6 = arith.addf %3, %5 : vector<16x64xf32>
    %cst_5 = arith.constant 5.000000e-01 : f32
    %7 = vector.broadcast %cst_5 : f32 to vector<16x64xf32>
    %8 = arith.mulf %7, %6 : vector<16x64xf32>
    %cst_6 = arith.constant 4.471500e-02 : f32
    %9 = vector.broadcast %cst_6 : f32 to vector<16x64xf32>
    %10 = arith.mulf %9, %6 : vector<16x64xf32>
    %11 = arith.mulf %10, %6 : vector<16x64xf32>
    %12 = arith.mulf %11, %6 : vector<16x64xf32>
    %13 = arith.addf %6, %12 : vector<16x64xf32>
    %cst_7 = arith.constant 0.797884583 : f32
    %14 = vector.broadcast %cst_7 : f32 to vector<16x64xf32>
    %15 = arith.mulf %14, %13 : vector<16x64xf32>
    %16 = math.tanh %15 : vector<16x64xf32>
    %cst_8 = arith.constant 1.000000e+00 : f32
    %17 = vector.broadcast %cst_8 : f32 to vector<16x64xf32>
    %18 = arith.addf %17, %16 : vector<16x64xf32>
    %19 = arith.mulf %8, %18 : vector<16x64xf32>
    %20 = arith.truncf %19 : vector<16x64xf32> to vector<16x64xbf16>
    %c0_9 = arith.constant 0 : index
    %c0_10 = arith.constant 0 : index
    %21 = vector.load %arg4[%c0_9, %c0_10] : memref<64x32xbf16, #tpu.memory_space<vmem>>, vector<64x32xbf16>
    %cst_11 = arith.constant dense<0.000000e+00> : vector<16x32xf32>
    %22 = tpu.matmul %20, %21, %cst_11 {dimension_numbers = #tpu.dot_dimension_numbers<[1], [0], [0], [1], [0, 0, 1, 1], [], []>} : vector<16x64xbf16>, vector<64x32xbf16>, vector<16x32xf32> -> vector<16x32xf32>
    %c0_12 = arith.constant 0 : index
    %c0_13 = arith.constant 0 : index
    %23 = vector.load %arg5[%c0_12, %c0_13] : memref<1x32xf32, #tpu.memory_space<vmem>>, vector<1x32xf32>
    %24 = vector.broadcast %23 : vector<1x32xf32> to vector<16x32xf32>
    %25 = arith.addf %22, %24 : vector<16x32xf32>
    %c0_14 = arith.constant 0 : index
    %c0_15 = arith.constant 0 : index
    %26 = vector.load %arg6[%c0_14, %c0_15] : memref<16x32xf32, #tpu.memory_space<vmem>>, vector<16x32xf32>
    tpu.vector_store %arg6[%c0_14, %c0_15], %25 {strides = array<i32>} : memref<16x32xf32, #tpu.memory_space<vmem>>, vector<16x32xf32>,
    return
  }
  func.func @transform_0(%arg0: i32) -> (i32, i32) {
    %c0_i32 = arith.constant 0 : i32
    %c0_i32_0 = arith.constant 0 : i32
    return %arg0, %c0_i32 : i32, i32
  }
  func.func @transform_1(%arg0: i32) -> (i32, i32) {
    %c0_i32 = arith.constant 0 : i32
    %c0_i32_0 = arith.constant 0 : i32
    %c0_i32_1 = arith.constant 0 : i32
    return %c0_i32, %c0_i32_0 : i32, i32
  }
  func.func @transform_2(%arg0: i32) -> (i32, i32) {
    %c0_i32 = arith.constant 0 : i32
    %c0_i32_0 = arith.constant 0 : i32
    %c0_i32_1 = arith.constant 0 : i32
    return %c0_i32, %c0_i32_0 : i32, i32
  }
  func.func @transform_3(%arg0: i32) -> (i32, i32) {
    %c0_i32 = arith.constant 0 : i32
    %c0_i32_0 = arith.constant 0 : i32
    %c0_i32_1 = arith.constant 0 : i32
    return %c0_i32, %c0_i32_0 : i32, i32
  }
  func.func @transform_4(%arg0: i32) -> (i32, i32) {
    %c0_i32 = arith.constant 0 : i32
    %c0_i32_0 = arith.constant 0 : i32
    %c0_i32_1 = arith.constant 0 : i32
    return %c0_i32, %c0_i32_0 : i32, i32
  }
  func.func @transform_5(%arg0: i32) -> (i32, i32) {
    %c0_i32 = arith.constant 0 : i32
    %c0_i32_0 = arith.constant 0 : i32
    return %arg0, %c0_i32 : i32, i32
  }
}

module attributes {stable_mosaic.version = 11 : i64} {
  func.func @mlp_kernel(%arg0: i32, %arg1: memref<16x32xf32, #tpu.memory_space<vmem>>, %arg2: memref<32x64xbf16, #tpu.memory_space<vmem>>, %arg3: memref<1x64xf32, #tpu.memory_space<vmem>>, %arg4: memref<64x32xbf16, #tpu.memory_space<vmem>>, %arg5: memref<1x32xf32, #tpu.memory_space<vmem>>, %arg6: memref<16x32xf32, #tpu.memory_space<vmem>>) attributes {dimension_semantics = [#tpu.dimension_semantics<parallel>], iteration_bounds = array<i64: 2>, scalar_prefetch = 0 : i64, scratch_operands = 0 : i64, tpu.core_type = #tpu.core_type<tc>, window_params = [{transform_indices = @transform_0, window_bounds = array<i64: 16, 32>}, {pipeline_mode = #tpu.pipeline_mode<synchronous>, transform_indices = @transform_1, window_bounds = array<i64: 32, 64>}, {pipeline_mode = #tpu.pipeline_mode<synchronous>, transform_indices = @transform_2, window_bounds = array<i64: 1, 64>}, {pipeline_mode = #tpu.pipeline_mode<synchronous>, transform_indices = @transform_3, window_bounds = array<i64: 64, 32>}, {pipeline_mode = #tpu.pipeline_mode<synchronous>, transform_indices = @transform_4, window_bounds = array<i64: 1, 32>}, {transform_indices = @transform_5, window_bounds = array<i64: 16, 32>}]} {
    %c0 = arith.constant 0 : index
    %c0_0 = arith.constant 0 : index
    %0 = vector.load %arg1[%c0, %c0_0] : memref<16x32xf32, #tpu.memory_space<vmem>>, vector<16x32xf32>
    %1 = arith.truncf %0 : vector<16x32xf32> to vector<16x32xbf16>
    %c0_1 = arith.constant 0 : index
    %c0_2 = arith.constant 0 : index
    %2 = vector.load %arg2[%c0_1, %c0_2] : memref<32x64xbf16, #tpu.memory_space<vmem>>, vector<32x64xbf16>
    %cst = arith.constant dense<0.000000e+00> : vector<16x64xf32>
    %3 = tpu.matmul %1, %2, %cst {dimension_numbers = #tpu.dot_dimension_numbers<[1], [0], [0], [1], [0, 0, 1, 1], [], []>} : vector<16x32xbf16>, vector<32x64xbf16>, vector<16x64xf32> -> vector<16x64xf32>
    %c0_3 = arith.constant 0 : index
    %c0_4 = arith.constant 0 : index
    %4 = vector.load %arg3[%c0_3, %c0_4] : memref<1x64xf32, #tpu.memory_space<vmem>>, vector<1x64xf32>
    %5 = vector.broadcast %4 : vector<1x64xf32> to vector<16x64xf32>
    %6 = arith.addf %3, %5 : vector<16x64xf32>
    %cst_5 = arith.constant 5.000000e-01 : f32
    %7 = vector.broadcast %cst_5 : f32 to vector<16x64xf32>
    %8 = arith.mulf %7, %6 : vector<16x64xf32>
    %cst_6 = arith.constant 4.471500e-02 : f32
    %9 = vector.broadcast %cst_6 : f32 to vector<16x64xf32>
    %10 = arith.mulf %9, %6 : vector<16x64xf32>
    %11 = arith.mulf %10, %6 : vector<16x64xf32>
    %12 = arith.mulf %11, %6 : vector<16x64xf32>
    %13 = arith.addf %6, %12 : vector<16x64xf32>
    %cst_7 = arith.constant 0.797884583 : f32
    %14 = vector.broadcast %cst_7 : f32 to vector<16x64xf32>
    %15 = arith.mulf %14, %13 : vector<16x64xf32>
    %16 = math.tanh %15 : vector<16x64xf32>
    %cst_8 = arith.constant 1.000000e+00 : f32
    %17 = vector.broadcast %cst_8 : f32 to vector<16x64xf32>
    %18 = arith.addf %17, %16 : vector<16x64xf32>
    %19 = arith.mulf %8, %18 : vector<16x64xf32>
    %20 = arith.truncf %19 : vector<16x64xf32> to vector<16x64xbf16>
    %c0_9 = arith.constant 0 : index
    %c0_10 = arith.constant 0 : index
    %21 = vector.load %arg4[%c0_9, %c0_10] : memref<64x32xbf16, #tpu.memory_space<vmem>>, vector<64x32xbf16>
    %cst_11 = arith.constant dense<0.000000e+00> : vector<16x32xf32>
    %22 = tpu.matmul %20, %21, %cst_11 {dimension_numbers = #tpu.dot_dimension_numbers<[1], [0], [0], [1], [0, 0, 1, 1], [], []>} : vector<16x64xbf16>, vector<64x32xbf16>, vector<16x32xf32> -> vector<16x32xf32>
    %c0_12 = arith.constant 0 : index
    %c0_13 = arith.constant 0 : index
    %23 = vector.load %arg5[%c0_12, %c0_13] : memref<1x32xf32, #tpu.memory_space<vmem>>, vector<1x32xf32>
    %24 = vector.broadcast %23 : vector<1x32xf32> to vector<16x32xf32>
    %25 = arith.addf %22, %24 : vector<16x32xf32>
    %c0_14 = arith.constant 0 : index
    %c0_15 = arith.constant 0 : index
    %26 = vector.load %arg6[%c0_14, %c0_15] : memref<16x32xf32, #tpu.memory_space<vmem>>, vector<16x32xf32>
    tpu.vector_store %arg6[%c0_14, %c0_15], %25 {strides = array<i32>} : memref<16x32xf32, #tpu.memory_space<vmem>>, vector<16x32xf32>,
    return
  }
  func.func @transform_0(%arg0: i32) -> (i32, i32) {
    %c0_i32 = arith.constant 0 : i32
    %c0_i32_0 = arith.constant 0 : i32
    return %arg0, %c0_i32 : i32, i32
  }
  func.func @transform_1(%arg0: i32) -> (i32, i32) {
    %c0_i32 = arith.constant 0 : i32
    %c0_i32_0 = arith.constant 0 : i32
    %c0_i32_1 = arith.constant 0 : i32
    return %c0_i32, %c0_i32_0 : i32, i32
  }
  func.func @transform_2(%arg0: i32) -> (i32, i32) {
    %c0_i32 = arith.constant 0 : i32
    %c0_i32_0 = arith.constant 0 : i32
    %c0_i32_1 = arith.constant 0 : i32
    return %c0_i32, %c0_i32_0 : i32, i32
  }
  func.func @transform_3(%arg0: i32) -> (i32, i32) {
    %c0_i32 = arith.constant 0 : i32
    %c0_i32_0 = arith.constant 0 : i32
    %c0_i32_1 = arith.constant 0 : i32
    return %c0_i32, %c0_i32_0 : i32, i32
  }
  func.func @transform_4(%arg0: i32) -> (i32, i32) {
    %c0_i32 = arith.constant 0 : i32
    %c0_i32_0 = arith.constant 0 : i32
    %c0_i32_1 = arith.constant 0 : i32
    return %c0_i32, %c0_i32_0 : i32, i32
  }
  func.func @transform_5(%arg0: i32) -> (i32, i32) {
    %c0_i32 = arith.constant 0 : i32
    %c0_i32_0 = arith.constant 0 : i32
    return %arg0, %c0_i32 : i32, i32
  }
}

</mosaic_0001>

<bundles_post_ra>
// kernel: tpu_custom_call.1
= control target key start
LH: loop header
LB: loop body
LE: loop exit
PB: predicated region body
PF: predicated region fallthrough
CT: control target
= control target key end

     0   :  { %10 = vsyncpa [#allocation3], 0  ;;  %s799_s0 = inlined_call_operand.vmem [shape: f32[24,32], index: 0, kind: input, shape index: {}]   ;;  %s800_s1 = inlined_call_operand.vmem [shape: bf16[32,64], index: 1, kind: input, shape index: {}]   ;;  %s801_s2 = inlined_call_operand.vmem [shape: f32[1,64], index: 2, kind: input, shape index: {}]   ;;  %s802_s3 = inlined_call_operand.vmem [shape: bf16[64,32], index: 3, kind: input, shape index: {}]   ;;  %s803_s4 = inlined_call_operand.vmem [shape: f32[1,32], index: 4, kind: input, shape index: {}]   ;;  %s804_s5 = inlined_call_operand.hbm [shape: f32[24,32], index: 5, kind: output, shape index: {}]  }
   0x1   :  { %12 = vsyncpa [#allocation3 + $0x1], 0  ;;  %s655_s18 = smov 0   ;;  %s657_s19 = smov 0  }
   0x2   :  { %s659_s20 = smov 0   ;;  %s661_s21 = smov 0  }
   0x3 LB: > { %s676_s22 = sadd.s32 4294967295, %s620_s21   ;;  %s452_s23 = sadd.s32 4294967294, %s620_s21   ;;  %s620_s21 = sphi %s661_s21, %s811_s21   ;;  %s616_s20 = sphi %s659_s20, %s810_s20   ;;  %s612_s19 = sphi %s657_s19, %s809_s19   ;;  %s608_s18 = sphi %s655_s18, %s808_s18  }
   0x4   : > { %s680_s24 = sadd.s32 1, %s620_s21   ;;  %s135_s25 = sadd.s32 1, %s616_s20 }
   0x5   : > { %s132_s26 = ssub.s32 %s620_s21, %s680_s24  ;;  %p145_p0 = scmp.ne.s32.totalorder %s616_s20, %s612_s19 }
   0x6   : > { %p133_p1 = scmp.eq.s32.totalorder %s132_s26, 0  ;;  %p146_p2 = scmp.eq.s32.totalorder %s676_s22, 1 }
   0x7   : > { %p151_p3 = scmp.ne.s32.totalorder %s612_s19, %s608_s18  ;;  %p152_p4 = scmp.eq.s32.totalorder %s452_s23, 1 }
   0x8   : > { %s691_s27 = scalar_select %p133_p1, %s616_s20, %s135_s25  }
   0x9   : > { %p693_p5 = por %p146_p2, %p145_p0  ;;  %p697_p6 = por %p152_p4, %p151_p3 }
   0xa   : > { %p455_p7 = scmp.ge.s32.totalorder %s620_s21, 1  ;;  %p199_p8 = scmp.lt.s32.totalorder %s620_s21, 3 }
   0xc   : > { %p200_p9 = pnand %p455_p7, %p199_p8 }
   0xd   : > { %s707_s7 = sshll.u32 (!%p200_p9), %s676_s22, 1 }
   0xe   : > { %203 = sbr.rel (%p200_p9) target bundleno = 354 (0x162), region = 40  ;;  %p236_p10 = scmp.lt.s32.totalorder (!%p200_p9), %s707_s7, 2 }
  0x13   : > { %v495_v0 = vld [vmem:[%s800_s1 + $0x8] sm:$0xff]  ;;  %v494_v1 = vld [vmem:[%s800_s1] sm:$0xff]  ;;  %s237_s10 = scalar_select %p236_p10, %s707_s7, 2  ;;  %vm274_vm0 = vcmask 261120   ;;  %v499_v5 = vld [vmem:[%s802_s3 + $0x18] sm:$0xff]  ;;  %vm347_vm1 = vcmask 523264  }
  0x14   : > { %284 = vmatpush.bf16.msra.mxu0 %v495_v0  ;;  %355 = vmatpush.bf16.msra.mxu1 %v499_v5  ;;  %v498_v6 = vld [vmem:[%s802_s3 + $0x10] sm:$0xff]  ;;  %v497_v7 = vld [vmem:[%s802_s3 + $0x8] sm:$0xff]  ;;  %v496_v8 = vld [vmem:[%s802_s3] sm:$0xff]  ;;  %s376_s16 = ssub.s32 (%p693_p5), 3, %s707_s7 }
  0x15   : > { %s458_s11 = sshll.u32 %s237_s10, 3  ;;  %v541_v9 = vld [vmem:[%s801_s2] ss:$0 sm:$0xff]  ;;  %s228_s10 = sand.u32 1, %s612_s19  }
  0x16   : > { %s239_s14 = scalar_lea.vmem %s799_s0, %s458_s11  ;;  %s456_s11 = sshll.u32 %s228_s10, 4  ;;  %v542_v33 = vld [vmem:[%s803_s4] ss:$0 sm:$0xff] }
  0x17   : > { %v251_v2 = vld [vmem:[%s239_s14] sm:$0xff]  ;;  %v252_v3 = vld [vmem:[%s239_s14 + $0x8] sm:$0xff]  ;;  %s230_s14 = scalar_lea.vmem [#allocation2], %s456_s11  ;;  %s739_s15 = scalar_lea.sflag [#allocation3], %s228_s10 }
  0x18   : > { %285 = vmatpush.bf16.msra.mxu0 %v494_v1  ;;  %v253_v4 = vpack.c.bf16 %v252_v3, %v251_v2  ;;  %356 = vmatpush.bf16.msra.mxu1 %v498_v6  ;;  %p377_p11 = scmp.lt.s32.totalorder (%p693_p5), %s376_s16, 2 }
  0x1b   : > { %467 = vmatmul.msk.bf16.vlgmr.msra.gmra.mxu0 %vm274_vm0, %v253_v4 }
  0x1c   : > { %357 = vmatpush.bf16.msra.mxu1 %v497_v7 }
  0x20   : > { %358 = vmatpush.bf16.msra.mxu1 %v496_v8 }
  0x98   : > { %v287_v10 = vpop.f32.mrf.mxu0 }
  0x99   : > { %v288_v11 = vadd.f32 %v541_v9, %v287_v10 }
  0x9b   : > { %v294_v12 = vmul.f32 0.044715, %v288_v11  ;;  %v292_v27 = vmul.f32 0.5, %v288_v11 }
  0x9d   : > { %v296_v13 = vmul.f32 %v294_v12, %v288_v11 }
  0x9f   : > { %v298_v14 = vmul.f32 %v296_v13, %v288_v11 }
  0xa0   : > { %v289_v15 = vpop.f32.mrf.mxu0 }
  0xa1   : > { %v290_v16 = vadd.f32 %v541_v9, %v289_v15  ;;  %v300_v17 = vadd.f32 %v298_v14, %v288_v11 }
  0xa3   : > { %v295_v18 = vmul.f32 0.044715, %v290_v16  ;;  %v302_v20 = vmul.f32 0.7978846, %v300_v17  ;;  %v293_v28 = vmul.f32 0.5, %v290_v16 }
  0xa5   : > { %v297_v19 = vmul.f32 %v295_v18, %v290_v16  ;;  %543 = vtanh.f32 %v302_v20 }
  0xa7   : > { %v299_v21 = vmul.f32 %v297_v19, %v290_v16 }
  0xa9   : > { %v301_v22 = vadd.f32 %v299_v21, %v290_v16 }
  0xab   : > { %v303_v23 = vmul.f32 0.7978846, %v301_v22  ;;  %v544_v24 = vpop.eup %543 }
  0xac   : > { %v306_v25 = vadd.f32 1.0, %v544_v24 }
  0xad   : > { %545 = vtanh.f32 %v303_v23 }
  0xae   : > { %v308_v30 = vmul.f32 %v306_v25, %v292_v27 }
  0xb3   : > { %v546_v26 = vpop.eup %545 }
  0xb4   : > { %v307_v29 = vadd.f32 1.0, %v546_v26 }
  0xb6   : > { %v309_v31 = vmul.f32 %v307_v29, %v293_v28 }
  0xb8   : > { %v310_v32 = vpack.c.bf16 %v309_v31, %v308_v30 }
  0xba   : > { %484 = vmatmul.msk.bf16.vlgmr.msra.gmra.mxu1 %vm347_vm1, %v310_v32 }
 0x137   : > { %v360_v34 = vpop.f32.mrf.mxu1 }
 0x138   : > { %v361_v35 = vadd.f32 %v542_v33, %v360_v34 }
 0x13a   : > { %365 = vst.msk [vmem:[%s230_s14] sm:$0xff] %vm274_vm0, %v361_v35 }
 0x13e   : > { %374 = sbr.rel (!%p693_p5) target bundleno = 354 (0x162), region = 44 }
 0x13f   : > { %v362_v36 = vpop.f32.mrf.mxu1 }
 0x140   : > { %v363_v37 = vadd.f32 %v542_v33, %v362_v36 }
 0x142   : > { %366 = vst.msk [vmem:[%s230_s14 + $0x8] sm:$0xff] %vm274_vm0, %v363_v37 }
 0x143   : > { %s813_s16 = smov (!%p377_p11, %s376_s16), 2 }
 0x144   : > { %s487_s17 = sshll.u32 %s813_s16, 3 }
 0x145   : > { %s380_s23 = ssub.s32 16, %s487_s17 }
 0x146   : > { %s381_s25 = sshll.u32 %s380_s23, 4 }
 0x147   : > { %382 = vsyncadd %s739_s15, %s381_s25  ;;  %p748_p12 = scmp.ne.s32.totalorder %s487_s17, 0  ;;  %s500_s28 = sshll.u32 %s676_s22, 4 }
 0x148   : > { %s385_s7 = scalar_lea.hbm %s804_s5, %s500_s28  ;;  %s387_s8 = sshll.u32 %s230_s14, 4  ;;  %s756_s8 = int_to_ptr.vmem [resolvable:$true] %s387_s8 }
 0x149   : > { %s389_s9 = sshll.u32 %s385_s7, 4  ;;  %s491_s10 = sshll.u32 %s813_s16, 7  ;;  %s758_s9 = int_to_ptr.hbm [resolvable:$true] %s389_s9 }
 0x14a   : > { %s547_s11 = sshra.s32 %s756_s8, 4  ;;  %s549_s12 = sshrl.u32 %s491_s10, 4  ;;  %s548_s11 = int_to_ptr.vmem [resolvable:$true] %s547_s11 }
 0x14b   : > { %s554_s13 = scalar_lea.vmem %s548_s11, %s549_s12  ;;  %s622_s22 = smov [#allocation2]  }
 0x14c   : > { %p555_p13 = scmp.ne.s32.totalorder %s548_s11, %s554_s13  ;;  %s558_s17 = scalar_lea.vmem %s622_s22, 32 }
 0x14d   : > { %p560_p2 = scmp.lt.s32.totalorder %s558_s17, %s554_s13 }
 0x14e   : > { %p556_p0 = pnand %p555_p13, %p748_p12 }
 0x150   : > { %p557_p1 = pneg %p556_p0 }
 0x152   : > { %p562_p3 = pnand %p560_p2, %p557_p1 }
 0x154   : > { %565 = shalt.err (!%p562_p3)
}
 0x155   : > { %s566_s14 = sshra.s32 %s758_s9, 4  ;;  %s577_s30 = scalar_lea.hbm %s804_s5, 24  ;;  %s567_s14 = int_to_ptr.hbm [resolvable:$true] %s566_s14 }
 0x156   : > { %s573_s23 = scalar_lea.hbm %s567_s14, %s549_s12  ;;  %p578_p8 = scmp.lt.s32.totalorder %s567_s14, %s804_s5 }
 0x157   : > { %p574_p4 = scmp.ne.s32.totalorder %s567_s14, %s573_s23  ;;  %p579_p9 = scmp.lt.s32.totalorder %s577_s30, %s573_s23 }
 0x159   : > { %p575_p5 = pnand %p574_p4, %p748_p12  ;;  %p580_p10 = por %p579_p9, %p578_p8 }
 0x15b   : > { %p576_p7 = pneg %p575_p5 }
 0x15d   : > { %p581_p11 = pnand %p580_p10, %p576_p7 }
 0x15f   : > { %584 = shalt.err (!%p581_p11)
}
 0x160   : > { %s623_s11 = smov 128   ;;  %s624_s12 = smov 8  }
 0x161   : > { %395 = dma.vmem_to_hbm [thread:$0]  (%p748_p12), %s756_s8, %s491_s10, %s758_s9, %s739_s15, %s623_s11, %s623_s11, %s624_s12  }
 0x162 PF: > { %p506_p13 = scmp.ge.s32.totalorder %s620_s21, 2  ;;  %s404_s13 = sand.u32 1, %s608_s18  }
 0x163   : > { %s405_s22 = scalar_lea.sflag [#allocation3], %s404_s13 }
 0x164   : > { %p503_p0 = pnand %p506_p13, %p697_p6 }
 0x166   : > { %p504_p1 = pneg %p503_p0 }
 0x168   : > { %603 = dma.done.wait (%p504_p1), %s405_s22, 256  }
 0x169   : > { %605 = vsyncadd (%p504_p1), %s405_s22, 4294967040  ;;  %p15_p2 = scmp.ge.s32.totalorder %s680_s24, 4   ;;  %s808_s18 = smov %s612_s19 }
 0x16a   : > { %s809_s19 = smov %s616_s20  ;;  %s810_s20 = smov %s691_s27 }
 0x16b   : > { %s811_s21 = smov %s680_s24  ;;  %17 = sbr.rel (!%p15_p2) target bundleno = 3 (0x3), region = 75 }
 0x170   :  { %411 = vsyncpa [#allocation3], 1 }
 0x171   :  { %413 = vsyncpa [#allocation3 + $0x1], 1 }

// kernel: tpu_custom_call.1
= control target key start
LH: loop header
LB: loop body
LE: loop exit
PB: predicated region body
PF: predicated region fallthrough
CT: control target
= control target key end

     0   :  { %10 = vsyncpa [#allocation3], 0  ;;  %s799_s0 = inlined_call_operand.vmem [shape: f32[24,32], index: 0, kind: input, shape index: {}]   ;;  %s800_s1 = inlined_call_operand.vmem [shape: bf16[32,64], index: 1, kind: input, shape index: {}]   ;;  %s801_s2 = inlined_call_operand.vmem [shape: f32[1,64], index: 2, kind: input, shape index: {}]   ;;  %s802_s3 = inlined_call_operand.vmem [shape: bf16[64,32], index: 3, kind: input, shape index: {}]   ;;  %s803_s4 = inlined_call_operand.vmem [shape: f32[1,32], index: 4, kind: input, shape index: {}]   ;;  %s804_s5 = inlined_call_operand.hbm [shape: f32[24,32], index: 5, kind: output, shape index: {}]  }
   0x1   :  { %12 = vsyncpa [#allocation3 + $0x1], 0  ;;  %s655_s18 = smov 0   ;;  %s657_s19 = smov 0  }
   0x2   :  { %s659_s20 = smov 0   ;;  %s661_s21 = smov 0  }
   0x3 LB: > { %s676_s22 = sadd.s32 4294967295, %s620_s21   ;;  %s452_s23 = sadd.s32 4294967294, %s620_s21   ;;  %s620_s21 = sphi %s661_s21, %s811_s21   ;;  %s616_s20 = sphi %s659_s20, %s810_s20   ;;  %s612_s19 = sphi %s657_s19, %s809_s19   ;;  %s608_s18 = sphi %s655_s18, %s808_s18  }
   0x4   : > { %s680_s24 = sadd.s32 1, %s620_s21   ;;  %s135_s25 = sadd.s32 1, %s616_s20 }
   0x5   : > { %s132_s26 = ssub.s32 %s620_s21, %s680_s24  ;;  %p145_p0 = scmp.ne.s32.totalorder %s616_s20, %s612_s19 }
   0x6   : > { %p133_p1 = scmp.eq.s32.totalorder %s132_s26, 0  ;;  %p146_p2 = scmp.eq.s32.totalorder %s676_s22, 1 }
   0x7   : > { %p151_p3 = scmp.ne.s32.totalorder %s612_s19, %s608_s18  ;;  %p152_p4 = scmp.eq.s32.totalorder %s452_s23, 1 }
   0x8   : > { %s691_s27 = scalar_select %p133_p1, %s616_s20, %s135_s25  }
   0x9   : > { %p693_p5 = por %p146_p2, %p145_p0  ;;  %p697_p6 = por %p152_p4, %p151_p3 }
   0xa   : > { %p455_p7 = scmp.ge.s32.totalorder %s620_s21, 1  ;;  %p199_p8 = scmp.lt.s32.totalorder %s620_s21, 3 }
   0xc   : > { %p200_p9 = pnand %p455_p7, %p199_p8 }
   0xd   : > { %s707_s7 = sshll.u32 (!%p200_p9), %s676_s22, 1 }
   0xe   : > { %203 = sbr.rel (%p200_p9) target bundleno = 354 (0x162), region = 40  ;;  %p236_p10 = scmp.lt.s32.totalorder (!%p200_p9), %s707_s7, 2 }
  0x13   : > { %v495_v0 = vld [vmem:[%s800_s1 + $0x8] sm:$0xff]  ;;  %v494_v1 = vld [vmem:[%s800_s1] sm:$0xff]  ;;  %s237_s10 = scalar_select %p236_p10, %s707_s7, 2  ;;  %vm274_vm0 = vcmask 261120   ;;  %v499_v5 = vld [vmem:[%s802_s3 + $0x18] sm:$0xff]  ;;  %vm347_vm1 = vcmask 523264  }
  0x14   : > { %284 = vmatpush.bf16.msra.mxu0 %v495_v0  ;;  %355 = vmatpush.bf16.msra.mxu1 %v499_v5  ;;  %v498_v6 = vld [vmem:[%s802_s3 + $0x10] sm:$0xff]  ;;  %v497_v7 = vld [vmem:[%s802_s3 + $0x8] sm:$0xff]  ;;  %v496_v8 = vld [vmem:[%s802_s3] sm:$0xff]  ;;  %s376_s16 = ssub.s32 (%p693_p5), 3, %s707_s7 }
  0x15   : > { %s458_s11 = sshll.u32 %s237_s10, 3  ;;  %v541_v9 = vld [vmem:[%s801_s2] ss:$0 sm:$0xff]  ;;  %s228_s10 = sand.u32 1, %s612_s19  }
  0x16   : > { %s239_s14 = scalar_lea.vmem %s799_s0, %s458_s11  ;;  %s456_s11 = sshll.u32 %s228_s10, 4  ;;  %v542_v33 = vld [vmem:[%s803_s4] ss:$0 sm:$0xff] }
  0x17   : > { %v251_v2 = vld [vmem:[%s239_s14] sm:$0xff]  ;;  %v252_v3 = vld [vmem:[%s239_s14 + $0x8] sm:$0xff]  ;;  %s230_s14 = scalar_lea.vmem [#allocation2], %s456_s11  ;;  %s739_s15 = scalar_lea.sflag [#allocation3], %s228_s10 }
  0x18   : > { %285 = vmatpush.bf16.msra.mxu0 %v494_v1  ;;  %v253_v4 = vpack.c.bf16 %v252_v3, %v251_v2  ;;  %356 = vmatpush.bf16.msra.mxu1 %v498_v6  ;;  %p377_p11 = scmp.lt.s32.totalorder (%p693_p5), %s376_s16, 2 }
  0x1b   : > { %467 = vmatmul.msk.bf16.vlgmr.msra.gmra.mxu0 %vm274_vm0, %v253_v4 }
  0x1c   : > { %357 = vmatpush.bf16.msra.mxu1 %v497_v7 }
  0x20   : > { %358 = vmatpush.bf16.msra.mxu1 %v496_v8 }
  0x98   : > { %v287_v10 = vpop.f32.mrf.mxu0 }
  0x99   : > { %v288_v11 = vadd.f32 %v541_v9, %v287_v10 }
  0x9b   : > { %v294_v12 = vmul.f32 0.044715, %v288_v11  ;;  %v292_v27 = vmul.f32 0.5, %v288_v11 }
  0x9d   : > { %v296_v13 = vmul.f32 %v294_v12, %v288_v11 }
  0x9f   : > { %v298_v14 = vmul.f32 %v296_v13, %v288_v11 }
  0xa0   : > { %v289_v15 = vpop.f32.mrf.mxu0 }
  0xa1   : > { %v290_v16 = vadd.f32 %v541_v9, %v289_v15  ;;  %v300_v17 = vadd.f32 %v298_v14, %v288_v11 }
  0xa3   : > { %v295_v18 = vmul.f32 0.044715, %v290_v16  ;;  %v302_v20 = vmul.f32 0.7978846, %v300_v17  ;;  %v293_v28 = vmul.f32 0.5, %v290_v16 }
  0xa5   : > { %v297_v19 = vmul.f32 %v295_v18, %v290_v16  ;;  %543 = vtanh.f32 %v302_v20 }
  0xa7   : > { %v299_v21 = vmul.f32 %v297_v19, %v290_v16 }
  0xa9   : > { %v301_v22 = vadd.f32 %v299_v21, %v290_v16 }
  0xab   : > { %v303_v23 = vmul.f32 0.7978846, %v301_v22  ;;  %v544_v24 = vpop.eup %543 }
  0xac   : > { %v306_v25 = vadd.f32 1.0, %v544_v24 }
  0xad   : > { %545 = vtanh.f32 %v303_v23 }
  0xae   : > { %v308_v30 = vmul.f32 %v306_v25, %v292_v27 }
  0xb3   : > { %v546_v26 = vpop.eup %545 }
  0xb4   : > { %v307_v29 = vadd.f32 1.0, %v546_v26 }
  0xb6   : > { %v309_v31 = vmul.f32 %v307_v29, %v293_v28 }
  0xb8   : > { %v310_v32 = vpack.c.bf16 %v309_v31, %v308_v30 }
  0xba   : > { %484 = vmatmul.msk.bf16.vlgmr.msra.gmra.mxu1 %vm347_vm1, %v310_v32 }
 0x137   : > { %v360_v34 = vpop.f32.mrf.mxu1 }
 0x138   : > { %v361_v35 = vadd.f32 %v542_v33, %v360_v34 }
 0x13a   : > { %365 = vst.msk [vmem:[%s230_s14] sm:$0xff] %vm274_vm0, %v361_v35 }
 0x13e   : > { %374 = sbr.rel (!%p693_p5) target bundleno = 354 (0x162), region = 44 }
 0x13f   : > { %v362_v36 = vpop.f32.mrf.mxu1 }
 0x140   : > { %v363_v37 = vadd.f32 %v542_v33, %v362_v36 }
 0x142   : > { %366 = vst.msk [vmem:[%s230_s14 + $0x8] sm:$0xff] %vm274_vm0, %v363_v37 }
 0x143   : > { %s813_s16 = smov (!%p377_p11, %s376_s16), 2 }
 0x144   : > { %s487_s17 = sshll.u32 %s813_s16, 3 }
 0x145   : > { %s380_s23 = ssub.s32 16, %s487_s17 }
 0x146   : > { %s381_s25 = sshll.u32 %s380_s23, 4 }
 0x147   : > { %382 = vsyncadd %s739_s15, %s381_s25  ;;  %p748_p12 = scmp.ne.s32.totalorder %s487_s17, 0  ;;  %s500_s28 = sshll.u32 %s676_s22, 4 }
 0x148   : > { %s385_s7 = scalar_lea.hbm %s804_s5, %s500_s28  ;;  %s387_s8 = sshll.u32 %s230_s14, 4  ;;  %s756_s8 = int_to_ptr.vmem [resolvable:$true] %s387_s8 }
 0x149   : > { %s389_s9 = sshll.u32 %s385_s7, 4  ;;  %s491_s10 = sshll.u32 %s813_s16, 7  ;;  %s758_s9 = int_to_ptr.hbm [resolvable:$true] %s389_s9 }
 0x14a   : > { %s547_s11 = sshra.s32 %s756_s8, 4  ;;  %s549_s12 = sshrl.u32 %s491_s10, 4  ;;  %s548_s11 = int_to_ptr.vmem [resolvable:$true] %s547_s11 }
 0x14b   : > { %s554_s13 = scalar_lea.vmem %s548_s11, %s549_s12  ;;  %s622_s22 = smov [#allocation2]  }
 0x14c   : > { %p555_p13 = scmp.ne.s32.totalorder %s548_s11, %s554_s13  ;;  %s558_s17 = scalar_lea.vmem %s622_s22, 32 }
 0x14d   : > { %p560_p2 = scmp.lt.s32.totalorder %s558_s17, %s554_s13 }
 0x14e   : > { %p556_p0 = pnand %p555_p13, %p748_p12 }
 0x150   : > { %p557_p1 = pneg %p556_p0 }
 0x152   : > { %p562_p3 = pnand %p560_p2, %p557_p1 }
 0x154   : > { %565 = shalt.err (!%p562_p3)
}
 0x155   : > { %s566_s14 = sshra.s32 %s758_s9, 4  ;;  %s577_s30 = scalar_lea.hbm %s804_s5, 24  ;;  %s567_s14 = int_to_ptr.hbm [resolvable:$true] %s566_s14 }
 0x156   : > { %s573_s23 = scalar_lea.hbm %s567_s14, %s549_s12  ;;  %p578_p8 = scmp.lt.s32.totalorder %s567_s14, %s804_s5 }
 0x157   : > { %p574_p4 = scmp.ne.s32.totalorder %s567_s14, %s573_s23  ;;  %p579_p9 = scmp.lt.s32.totalorder %s577_s30, %s573_s23 }
 0x159   : > { %p575_p5 = pnand %p574_p4, %p748_p12  ;;  %p580_p10 = por %p579_p9, %p578_p8 }
 0x15b   : > { %p576_p7 = pneg %p575_p5 }
 0x15d   : > { %p581_p11 = pnand %p580_p10, %p576_p7 }
 0x15f   : > { %584 = shalt.err (!%p581_p11)
}
 0x160   : > { %s623_s11 = smov 128   ;;  %s624_s12 = smov 8  }
 0x161   : > { %395 = dma.vmem_to_hbm [thread:$0]  (%p748_p12), %s756_s8, %s491_s10, %s758_s9, %s739_s15, %s623_s11, %s623_s11, %s624_s12  }
 0x162 PF: > { %p506_p13 = scmp.ge.s32.totalorder %s620_s21, 2  ;;  %s404_s13 = sand.u32 1, %s608_s18  }
 0x163   : > { %s405_s22 = scalar_lea.sflag [#allocation3], %s404_s13 }
 0x164   : > { %p503_p0 = pnand %p506_p13, %p697_p6 }
 0x166   : > { %p504_p1 = pneg %p503_p0 }
 0x168   : > { %603 = dma.done.wait (%p504_p1), %s405_s22, 256  }
 0x169   : > { %605 = vsyncadd (%p504_p1), %s405_s22, 4294967040  ;;  %p15_p2 = scmp.ge.s32.totalorder %s680_s24, 4   ;;  %s808_s18 = smov %s612_s19 }
 0x16a   : > { %s809_s19 = smov %s616_s20  ;;  %s810_s20 = smov %s691_s27 }
 0x16b   : > { %s811_s21 = smov %s680_s24  ;;  %17 = sbr.rel (!%p15_p2) target bundleno = 3 (0x3), region = 75 }
 0x170   :  { %411 = vsyncpa [#allocation3], 1 }
 0x171   :  { %413 = vsyncpa [#allocation3 + $0x1], 1 }

</bundles_post_ra>
